<compile_context>
chip_gen: v7x
topology: tpu7x:2x2x1
jax: 0.10.0
libtpu: 0.0.40
codegen_flags: <defaults>
</compile_context>

<pallas_src>
import functools

import jax
import jax.numpy as jnp
from jax.experimental import pallas as pl
from jax.experimental.pallas import tpu as pltpu


def _round_up(x: int, m: int) -> int:
    return ((x + m - 1) // m) * m


def _choose_tile(dim: int, unit: int, cap: int) -> int:
    """Balanced tile: a multiple of `unit`, <= max(cap, unit), minimizing both
    padding and the number of grid steps along this dimension."""
    cap = max(unit, cap)
    d = _round_up(dim, unit)
    if d <= cap:
        return d
    steps = -(-d // cap)
    return _round_up(-(-d // steps), unit)


def _plan_m(M: int, tm_cap: int):
    unit = 256 if M >= 256 else 16          # bf16 sublane packing minimum is 16
    tm = _choose_tile(M, unit, tm_cap)
    return tm, _round_up(M, tm)


def _plan_nk(K: int, N: int, tn_cap: int, tk_cap: int):
    n_unit = 256 if N >= 256 else 128       # feed the full 2x256x256 MXU when possible
    tn = _choose_tile(N, n_unit, tn_cap)
    N_p = _round_up(N, tn)
    # v7x dual-TensorCore: when a sizeable problem would otherwise be a single
    # (i, j) output block, split the parallel j axis in two so both cores get
    # work (harmless no-op on the single-TC v5e/v6e).
    if N_p // tn == 1 and N_p >= 512:
        tn = _round_up(-(-N_p // 2), 128)
        N_p = _round_up(N, tn)
    tk = _choose_tile(K, 128, tk_cap)
    K_p = _round_up(K, tk)
    return tn, tk, N_p, K_p


def _pad_cast(a, shape, dtype):
    a = a.astype(dtype)
    if a.shape == tuple(shape):
        return a                                   # already tile-aligned: no pad pass
    pad = [(0, s - d) for s, d in zip(shape, a.shape)]
    return jnp.pad(a, pad)


def prepare_fc_params(weights, bias=None, *, tn_cap=1024, tk_cap=2048):
    """Pad + bf16-cast the reused parameters ONCE (not on every forward call)."""
    K, N = weights.shape
    tn, tk, N_p, K_p = _plan_nk(K, N, tn_cap, tk_cap)
    if bias is None:
        bias = jnp.zeros((N,), jnp.float32)
    w_p = _pad_cast(weights, (K_p, N_p), jnp.bfloat16)
    b_p = _pad_cast(bias.reshape(1, N), (1, N_p), jnp.float32)
    return dict(K=K, N=N, tn=tn, tk=tk, N_p=N_p, K_p=K_p, w_p=w_p, b_p=b_p)


def _fc_single_k_kernel(x_ref, w_ref, b_ref, o_ref, *, use_bias: bool):
    """gk == 1 fast path: whole K fits one tile; no accumulator scratch."""
    acc = jnp.dot(x_ref[...], w_ref[...], preferred_element_type=jnp.float32)
    out = jnp.tanh(acc)                     # act_fn in f32
    if use_bias:
        out = out + b_ref[...]              # bias added AFTER activation (module spec)
    o_ref[...] = out.astype(o_ref.dtype)


def _fc_multi_k_kernel(x_ref, w_ref, b_ref, o_ref, acc_ref, *, use_bias: bool):
    """One (tm, tn) output tile, accumulated over the trailing K grid axis.

    x_ref:   (tm, tk)  bf16   w_ref: (tk, tn) bf16   b_ref: (1, tn) f32
    o_ref:   (tm, tn)  caller dtype     acc_ref: (tm, tn) f32 VMEM scratch
    """
    k = pl.program_id(2)
    partial = jnp.dot(x_ref[...], w_ref[...], preferred_element_type=jnp.float32)

    @pl.when(k == 0)
    def _first():                           # direct store: no zero-init pass
        acc_ref[...] = partial

    @pl.when(k > 0)
    def _accum():
        acc_ref[...] += partial

    @pl.when(k == pl.num_programs(2) - 1)
    def _epilogue():                        # tanh + bias in f32, once per tile
        out = jnp.tanh(acc_ref[...])
        if use_bias:
            out = out + b_ref[...]
        o_ref[...] = out.astype(o_ref.dtype)


def fc_layer_forward(inp, weights=None, bias=None, *, use_bias=False,
                     prepared=None, tm_cap=512, tn_cap=1024, tk_cap=2048):
    """FCLayer.forward: tanh(inp @ weights) [+ bias].

    inp:      (M, K) float array (cast to bf16 for the MXU)
    weights:  (K, N) — ignored if `prepared` is given
    bias:     (N,)   — ignored if `prepared` is given
    prepared: optional result of prepare_fc_params(weights, bias), so the
              weight pad/cast is hoisted out of the per-call path.
    returns   (M, N) in inp.dtype
    """
    if prepared is None:
        prepared = prepare_fc_params(weights, bias, tn_cap=tn_cap, tk_cap=tk_cap)
    K, N = prepared["K"], prepared["N"]
    tn, tk = prepared["tn"], prepared["tk"]
    N_p, K_p = prepared["N_p"], prepared["K_p"]
    w_p, b_p = prepared["w_p"], prepared["b_p"]

    M, K_in = inp.shape
    assert K_in == K, "in_size mismatch"
    out_dtype = inp.dtype

    tm, M_p = _plan_m(M, tm_cap)
    x_p = _pad_cast(inp, (M_p, K_p), jnp.bfloat16)   # K-padding contributes 0 to the dot

    gi, gj, gk = M_p // tm, N_p // tn, K_p // tk
    out_bytes = M_p * N_p * jnp.dtype(out_dtype).itemsize
    cost = pl.CostEstimate(
        flops=2 * M_p * N_p * K_p,
        transcendentals=M_p * N_p,                    # tanh
        bytes_accessed=2 * M_p * K_p + 2 * K_p * N_p + 4 * N_p + out_bytes,
    )

    if gk == 1:
        # Single-K fast path (covers the pypc-typical tiny layers as a single
        # block): no accumulator scratch, no reduction grid axis.
        kernel = functools.partial(_fc_single_k_kernel, use_bias=use_bias)
        grid_spec = pltpu.PrefetchScalarGridSpec(
            num_scalar_prefetch=0,
            grid=(gi, gj),
            in_specs=[
                pl.BlockSpec((tm, tk), lambda i, j: (i, 0)),   # x
                pl.BlockSpec((tk, tn), lambda i, j: (0, j)),   # W
                pl.BlockSpec((1, tn), lambda i, j: (0, j)),    # bias
            ],
            out_specs=pl.BlockSpec((tm, tn), lambda i, j: (i, j)),
        )
        dims = ("parallel", "parallel")
    else:
        kernel = functools.partial(_fc_multi_k_kernel, use_bias=use_bias)
        grid_spec = pltpu.PrefetchScalarGridSpec(
            num_scalar_prefetch=0,
            grid=(gi, gj, gk),                                 # K (reduction) axis last
            in_specs=[
                pl.BlockSpec((tm, tk), lambda i, j, k: (i, k)),   # x
                pl.BlockSpec((tk, tn), lambda i, j, k: (k, j)),   # W
                pl.BlockSpec((1, tn), lambda i, j, k: (0, j)),    # bias
            ],
            out_specs=pl.BlockSpec((tm, tn), lambda i, j, k: (i, j)),
            scratch_shapes=[pltpu.VMEM((tm, tn), jnp.float32)],
        )
        dims = ("parallel", "parallel", "arbitrary")

    out_p = pl.pallas_call(
        kernel,
        out_shape=jax.ShapeDtypeStruct((M_p, N_p), out_dtype),
        grid_spec=grid_spec,
        compiler_params=pltpu.CompilerParams(dimension_semantics=dims),
        cost_estimate=cost,
    )(x_p, w_p, b_p)

    if (M_p, N_p) == (M, N):
        return out_p
    return out_p[:M, :N]


if __name__ == "__main__":
    key = jax.random.PRNGKey(0)
    k_x1, k_w1, k_x2, k_w2 = jax.random.split(key, 4)

    # Case 1: pypc-typical tiny layer (non-kaiming init: W ~ N(0, 0.05), b = 0)
    # -> single-block fast path (gk == 1). Weights padded/cast once and reused.
    batch, in_size, out_size = 8, 32, 32
    x1 = jax.random.normal(k_x1, (batch, in_size), dtype=jnp.float32)
    w1 = 0.05 * jax.random.normal(k_w1, (in_size, out_size), dtype=jnp.float32)
    b1 = jnp.zeros((out_size,), dtype=jnp.float32)

    prep1 = prepare_fc_params(w1, b1)          # hoisted pad/cast (once per param update)
    out1 = fc_layer_forward(x1, use_bias=True, prepared=prep1)
    out1 = jax.block_until_ready(out1)
    ref1 = jnp.tanh(x1 @ w1) + b1              # bias added AFTER tanh, per module spec
    assert out1.shape == (batch, out_size)
    assert jnp.allclose(out1, ref1, atol=2e-2, rtol=2e-2), float(
        jnp.max(jnp.abs(out1 - ref1)))

    # Case 2: exercise the tiled (i, j, k) multi-K accumulation path — small
    # shapes with artificially small tile caps so the test stays fast while
    # covering the big-GEMM code path (first-step store, K accumulation,
    # epilogue, N padding).
    M2, K2, N2 = 64, 384, 320
    x2 = jax.random.normal(k_x2, (M2, K2), dtype=jnp.float32)
    w2 = 0.05 * jax.random.normal(k_w2, (K2, N2), dtype=jnp.float32)
    b2 = jnp.zeros((N2,), dtype=jnp.float32)

    out2 = fc_layer_forward(x2, w2, b2, use_bias=True,
                            tm_cap=32, tn_cap=256, tk_cap=128)
    out2 = jax.block_until_ready(out2)
    ref2 = jnp.tanh(x2 @ w2) + b2
    assert out2.shape == (M2, N2)
    assert jnp.allclose(out2, ref2, atol=2e-2, rtol=2e-2), float(
        jnp.max(jnp.abs(out2 - ref2)))

    print("KERNEL_OK")
</pallas_src>

<mosaic_0001>
module attributes {stable_mosaic.version = 11 : i64} {
  func.func @_fc_single_k_kernel(%arg0: i32, %arg1: i32, %arg2: memref<16x128xbf16, #tpu.memory_space<vmem>>, %arg3: memref<128x128xbf16, #tpu.memory_space<vmem>>, %arg4: memref<1x128xf32, #tpu.memory_space<vmem>>, %arg5: memref<16x128xf32, #tpu.memory_space<vmem>>) attributes {dimension_semantics = [#tpu.dimension_semantics<parallel>, #tpu.dimension_semantics<parallel>], iteration_bounds = array<i64: 1, 1>, scalar_prefetch = 0 : i64, scratch_operands = 0 : i64, tpu.core_type = #tpu.core_type<tc>, window_params = [{transform_indices = @transform_0, window_bounds = array<i64: 16, 128>}, {transform_indices = @transform_1, window_bounds = array<i64: 128, 128>}, {transform_indices = @transform_2, window_bounds = array<i64: 1, 128>}, {transform_indices = @transform_3, window_bounds = array<i64: 16, 128>}]} {
    %c0 = arith.constant 0 : index
    %c0_0 = arith.constant 0 : index
    %0 = vector.load %arg2[%c0, %c0_0] : memref<16x128xbf16, #tpu.memory_space<vmem>>, vector<16x128xbf16>
    %c0_1 = arith.constant 0 : index
    %c0_2 = arith.constant 0 : index
    %1 = vector.load %arg3[%c0_1, %c0_2] : memref<128x128xbf16, #tpu.memory_space<vmem>>, vector<128x128xbf16>
    %cst = arith.constant dense<0.000000e+00> : vector<16x128xf32>
    %2 = tpu.matmul %0, %1, %cst {dimension_numbers = #tpu.dot_dimension_numbers<[1], [0], [0], [1], [0, 0, 1, 1], [], []>} : vector<16x128xbf16>, vector<128x128xbf16>, vector<16x128xf32> -> vector<16x128xf32>
    %3 = math.tanh %2 : vector<16x128xf32>
    %c0_3 = arith.constant 0 : index
    %c0_4 = arith.constant 0 : index
    %4 = vector.load %arg4[%c0_3, %c0_4] : memref<1x128xf32, #tpu.memory_space<vmem>>, vector<1x128xf32>
    %5 = vector.broadcast %4 : vector<1x128xf32> to vector<16x128xf32>
    %6 = arith.addf %3, %5 : vector<16x128xf32>
    %c0_5 = arith.constant 0 : index
    %c0_6 = arith.constant 0 : index
    %7 = vector.load %arg5[%c0_5, %c0_6] : memref<16x128xf32, #tpu.memory_space<vmem>>, vector<16x128xf32>
    tpu.vector_store %arg5[%c0_5, %c0_6], %6 {strides = array<i32>} : memref<16x128xf32, #tpu.memory_space<vmem>>, vector<16x128xf32>,
    return
  }
  func.func @transform_0(%arg0: i32, %arg1: i32) -> (i32, i32) {
    %c0_i32 = arith.constant 0 : i32
    %c0_i32_0 = arith.constant 0 : i32
    return %arg0, %c0_i32 : i32, i32
  }
  func.func @transform_1(%arg0: i32, %arg1: i32) -> (i32, i32) {
    %c0_i32 = arith.constant 0 : i32
    %c0_i32_0 = arith.constant 0 : i32
    return %c0_i32, %arg1 : i32, i32
  }
  func.func @transform_2(%arg0: i32, %arg1: i32) -> (i32, i32) {
    %c0_i32 = arith.constant 0 : i32
    %c0_i32_0 = arith.constant 0 : i32
    return %c0_i32, %arg1 : i32, i32
  }
  func.func @transform_3(%arg0: i32, %arg1: i32) -> (i32, i32) {
    %c0_i32 = arith.constant 0 : i32
    return %arg0, %arg1 : i32, i32
  }
}

</mosaic_0001>

<bundles_post_ra>
// kernel: tpu_custom_call.1
= control target key start
LH: loop header
LB: loop body
LE: loop exit
PB: predicated region body
PF: predicated region fallthrough
CT: control target
= control target key end

     0   :  { %8 = vsyncpa [#allocation3], 0  ;;  %s389_s0 = inlined_call_operand.hbm [shape: bf16[16,128], index: 0, kind: input, shape index: {}]   ;;  %s390_s1 = inlined_call_operand.hbm [shape: bf16[128,128], index: 1, kind: input, shape index: {}]   ;;  %s391_s2 = inlined_call_operand.vmem [shape: f32[1,128], index: 2, kind: input, shape index: {}]   ;;  %s392_s3 = inlined_call_operand.hbm [shape: f32[16,128], index: 3, kind: output, shape index: {}]  }
   0x1   :  { %9 = vsyncpa [#allocation6], 0 }
   0x2   :  { %10 = vsyncpa [#allocation4], 0  ;;  %s321_s12 = smov [#allocation2]   ;;  %s249_s16 = scalar_lea.hbm %s389_s0, 128 }
   0x3   :  { %s16_s13 = sshll.u32 %s321_s12, 4  ;;  %p250_p0 = scmp.ne.s32.totalorder %s389_s0, %s249_s16  ;;  %s17_s13 = int_to_ptr.vmem [resolvable:$true] %s16_s13 }
   0x4   :  { %p253_p1 = scmp.lt.u32.totalorder %s249_s16, %s389_s0 }
   0x6   :  { %p255_p2 = pnand %p253_p1, %p250_p0 }
   0x8   :  { %258 = shalt.err (!%p255_p2)
}
   0x9   :  { %s259_s21 = scalar_lea.vmem %s17_s13, 128  ;;  %p264_p4 = scmp.lt.s32.totalorder %s17_s13, %s17_s13 }
   0xa   :  { %p260_p3 = scmp.ne.s32.totalorder %s17_s13, %s259_s21  ;;  %p265_p5 = scmp.lt.s32.totalorder %s259_s21, %s259_s21 }
   0xc   :  { %p266_p6 = por %p265_p5, %p264_p4 }
   0xe   :  { %p267_p7 = pnand %p266_p6, %p260_p3 }
  0x10   :  { %270 = shalt.err (!%p267_p7)
}
  0x11   :  { %s322_s22 = smov 64   ;;  %s323_s23 = smov 4  }
  0x12   :  { %22 = dma.hbm_to_vmem [thread:$0]  %s389_s0, 128, %s17_s13, [#allocation3], %s322_s22, %s322_s22, %s323_s23  }
  0x13   :  { %s324_s26 = smov [#allocation5]   ;;  %s271_s30 = scalar_lea.hbm %s390_s1, 1024 }
  0x14   :  { %s28_s27 = sshll.u32 %s324_s26, 4  ;;  %p272_p8 = scmp.ne.s32.totalorder %s390_s1, %s271_s30  ;;  %s29_s27 = int_to_ptr.vmem [resolvable:$true] %s28_s27 }
  0x15   :  { %p275_p9 = scmp.lt.u32.totalorder %s271_s30, %s390_s1 }
  0x17   :  { %p277_p10 = pnand %p275_p9, %p272_p8 }
  0x19   :  { %280 = shalt.err (!%p277_p10)
}
  0x1a   :  { %s281_s8 = scalar_lea.vmem %s29_s27, 1024  ;;  %p286_p12 = scmp.lt.s32.totalorder %s29_s27, %s29_s27 }
  0x1b   :  { %p282_p11 = scmp.ne.s32.totalorder %s29_s27, %s281_s8  ;;  %p287_p13 = scmp.lt.s32.totalorder %s281_s8, %s281_s8 }
  0x1d   :  { %p288_p0 = por %p287_p13, %p286_p12 }
  0x1f   :  { %p289_p1 = pnand %p288_p0, %p282_p11 }
  0x21   :  { %292 = shalt.err (!%p289_p1)
}
  0x22   :  { %34 = dma.hbm_to_vmem [thread:$0]  %s390_s1, 1024, %s29_s27, [#allocation6], %s322_s22, %s322_s22, %s323_s23  }
  0x23   :  { %315 = dma.done.wait [#allocation3], 128  }
  0x24   :  { %316 = vsyncadd [#allocation3], 4294967168 }
  0x25   :  { %317 = dma.done.wait [#allocation6], 1024  }
  0x26   :  { %318 = vsyncadd [#allocation6], 4294966272  ;;  %v325_v0 = vmov 0.0   ;;  %vm326_vm0 = vmmov 0   ;;  %v236_v1 = vld [vmem:[#allocation5] sm:$0xff]   ;;  %v237_v2 = vld [vmem:[#allocation5 + $0x8] sm:$0xff]  }
  0x27   :  { %207 = vmatprep.subr.bf16.mxu0 %v325_v0  ;;  %223 = vmatprep.mubr.msk.bf16.mxu0 %vm326_vm0, %v325_v0  ;;  %v238_v3 = vld [vmem:[#allocation5 + $0x10] sm:$0xff]   ;;  %v239_v4 = vld [vmem:[#allocation5 + $0x18] sm:$0xff]   ;;  %v240_v5 = vld [vmem:[#allocation5 + $0x20] sm:$0xff]   ;;  %s327_s11 = smov [#allocation7]  }
  0x28   :  { %208 = vmatpush3.bf16.msra.mxu0 %v236_v1  ;;  %v241_v6 = vld [vmem:[#allocation5 + $0x28] sm:$0xff]   ;;  %v242_v7 = vld [vmem:[#allocation5 + $0x30] sm:$0xff]   ;;  %v243_v8 = vld [vmem:[#allocation5 + $0x38] sm:$0xff]   ;;  %s175_s12 = sshll.u32 %s327_s11, 4  ;;  %s176_s12 = int_to_ptr.vmem [resolvable:$true] %s175_s12 }
  0x29   :  { %209 = vmatprep.subr.bf16.mxu0 %v325_v0  ;;  %v244_v9 = vld [vmem:[#allocation2] sm:$0xff]   ;;  %s293_s13 = scalar_lea.vmem %s176_s12, 256  ;;  %p298_p3 = scmp.lt.s32.totalorder %s176_s12, %s176_s12 }
  0x2a   :  { %v197_v14 = vld [vmem:[%s391_s2] ss:$0 sm:$0xff]  ;;  %p294_p2 = scmp.ne.s32.totalorder %s176_s12, %s293_s13  ;;  %p299_p4 = scmp.lt.s32.totalorder %s293_s13, %s293_s13 }
  0x2c   :  { %210 = vmatpush3.bf16.msra.mxu0 %v237_v2  ;;  %p300_p5 = por %p299_p4, %p298_p3 }
  0x2d   :  { %211 = vmatprep.subr.bf16.mxu0 %v325_v0 }
  0x2e   :  { %p301_p6 = pnand %p300_p5, %p294_p2 }
  0x30   :  { %212 = vmatpush3.bf16.msra.mxu0 %v238_v3 }
  0x31   :  { %213 = vmatprep.subr.bf16.mxu0 %v325_v0 }
  0x34   :  { %214 = vmatpush3.bf16.msra.mxu0 %v239_v4 }
  0x35   :  { %215 = vmatprep.subr.bf16.mxu0 %v325_v0 }
  0x38   :  { %216 = vmatpush3.bf16.msra.mxu0 %v240_v5 }
  0x39   :  { %217 = vmatprep.subr.bf16.mxu0 %v325_v0 }
  0x3c   :  { %218 = vmatpush3.bf16.msra.mxu0 %v241_v6 }
  0x3d   :  { %219 = vmatprep.subr.bf16.mxu0 %v325_v0 }
  0x40   :  { %220 = vmatpush3.bf16.msra.mxu0 %v242_v7 }
  0x41   :  { %221 = vmatprep.subr.bf16.mxu0 %v325_v0 }
  0x44   :  { %222 = vmatpush3.bf16.msra.mxu0 %v243_v8 }
  0x47   :  { %224 = vmatmul.mubr.bf16.vlgmr.msra.gmra.mrb[0].mxu0 %v244_v9 }
 0x11a   :  { %v150_v10 = vpop.f32.mrb[0].mxu0 }
 0x11b   :  { %245 = vtanh.f32 %v150_v10  ;;  %v225_v11 = vpop.f32.mrb[1].mxu0 }
 0x11c   :  { %v153_v12 = vpop.f32.mrb[2].mxu0 }
 0x11d   :  { %247 = vtanh.f32 %v153_v12  ;;  %v226_v13 = vpop.f32.mrb[3].mxu0 }
 0x125   :  { %v246_v15 = vpop.eup %245 }
 0x126   :  { %v166_v16 = vadd.f32 %v246_v15, %v197_v14 }
 0x127   :  { %v248_v17 = vpop.eup %247 }
 0x128   :  { %v167_v18 = vadd.f32 %v248_v17, %v197_v14  ;;  %168 = vst [vmem:[#allocation7] sm:$0xff] %v166_v16 }
 0x12a   :  { %169 = vst [vmem:[#allocation7 + $0x8] sm:$0xff] %v167_v18 }
 0x12b   :  { %304 = shalt.err (!%p301_p6)
}
 0x12c   :  { %s305_s2 = scalar_lea.hbm %s392_s3, 256 }
 0x12d   :  { %p306_p7 = scmp.ne.s32.totalorder %s392_s3, %s305_s2  ;;  %p309_p8 = scmp.lt.u32.totalorder %s305_s2, %s392_s3 }
 0x12f   :  { %p311_p9 = pnand %p309_p8, %p306_p7 }
 0x131   :  { %314 = shalt.err (!%p311_p9)
}
 0x132   :  { %s328_s20 = smov 128   ;;  %s329_s21 = smov 8  }
 0x133   :  { %181 = dma.vmem_to_hbm [thread:$0]  %s176_s12, 256, %s392_s3, [#allocation4], %s328_s20, %s328_s20, %s329_s21  }
 0x134   :  { %319 = dma.done.wait [#allocation4], 256  }
 0x135   :  { %320 = vsyncadd [#allocation4], 4294967040 }
 0x136   :  { %185 = vsyncpa [#allocation3], 1 }
 0x137   :  { %186 = vsyncpa [#allocation6], 1 }
 0x138   :  { %187 = vsyncpa [#allocation4], 1 }

</bundles_post_ra>
